<compile_context>
chip_gen: v7x
topology: tpu7x:2x2x1
jax: 0.10.0
libtpu: 0.0.40
codegen_flags: <defaults>
</compile_context>

<pallas_src>
import jax
import jax.numpy as jnp
from jax.experimental import pallas as pl
from jax.experimental.pallas import tpu as pltpu


def _round_up(x, m):
    return (x + m - 1) // m * m


def _cdiv(a, b):
    return -(-a // b)


def _vmem_budget_and_limit():
    """Per-generation scoped-VMEM budget (tile sizing) and hard limit."""
    kind = ""
    try:
        kind = jax.devices()[0].device_kind.lower()
    except Exception:
        pass
    if "v5" in kind or "v6" in kind:
        # 128 MiB physical VMEM: let batch tiles fill it.
        return 80 * 1024 * 1024, 96 * 1024 * 1024
    if "v7" in kind:
        # 64 MiB per TensorCore; each TC keeps its own resident weight copy.
        return 40 * 1024 * 1024, 48 * 1024 * 1024
    # Unknown / older generations: conservative values known to compile.
    return 24 * 1024 * 1024, 32 * 1024 * 1024


def _enc_dec_kernel(x_ref, we_ref, be_ref, wdx_ref, wde_ref, bd_ref,
                    enc_ref, dec_ref):
    """Fused encoder + decoder for one batch tile.

    encoder: enc = relu(x @ We + be)
    decoder: dec = concat([x, enc], -1) @ Wd + bd
               == x @ Wd_x + enc @ Wd_e + bd    (split-weight form, same math)
    """
    x = x_ref[...].astype(jnp.bfloat16)                       # free VPU cast
    enc = jnp.dot(x, we_ref[...], preferred_element_type=jnp.float32)
    enc = jnp.maximum(enc + be_ref[...], 0.0)                  # f32 accumulate
    enc_bf = enc.astype(enc_ref.dtype)                         # bf16 writeback
    enc_ref[...] = enc_bf

    dec = jnp.dot(x, wdx_ref[...], preferred_element_type=jnp.float32)
    dec = dec + jnp.dot(enc_bf, wde_ref[...],
                        preferred_element_type=jnp.float32)
    dec_ref[...] = (dec + bd_ref[...]).astype(dec_ref.dtype)


def encoder_decoder_forward(x, we, be, wd, bd, *, out_dtype=jnp.bfloat16):
    """x: (B, D_in) f32; we: (D_in, H); be: (H,); wd: (D_in+H, D_out); bd: (D_out,)."""
    B, D_in = x.shape
    H = we.shape[1]
    D_out = wd.shape[1]
    assert wd.shape[0] == D_in + H

    # Split decoder weight: concat([x, enc]) @ Wd == x @ Wd_x + enc @ Wd_e.
    wdx, wde = wd[:D_in], wd[D_in:]

    # Pad feature dims to 128-lane multiples (unmasked vst, aligned MXU tiles).
    Dp_in, Hp, Dp_out = (_round_up(d, 128) for d in (D_in, H, D_out))

    budget, vmem_limit = _vmem_budget_and_limit()

    # Resident weights/biases are single-buffered (pl.Buffered(1)) -> no x2.
    w_bytes = 2 * (Dp_in * Hp + Dp_in * Dp_out + Hp * Dp_out)   # bf16
    b_bytes = 4 * (Hp + Dp_out)                                  # f32
    # Double-buffered per-row I/O; assume f32 x (worst case), bf16 outputs.
    row_bytes = 2 * (4 * Dp_in + 2 * Hp + 2 * Dp_out)
    if w_bytes + b_bytes + 16 * row_bytes > budget:
        # TODO(synk): tile the feature (K/N) dims with an accumulator grid axis
        # for very large widths instead of keeping full weights VMEM-resident.
        raise ValueError(
            f"Resident weights ({(w_bytes + b_bytes) / 2**20:.1f} MiB) do not "
            f"fit the {budget / 2**20:.0f} MiB VMEM budget; feature-dim tiling "
            "is not implemented.")

    # Batch tile: largest multiple of 16 (bf16 sublane packing) under budget.
    B16 = _round_up(B, 16)
    tb_cap = (budget - w_bytes - b_bytes) // row_bytes
    tb = max(16, min(B16, 1024, (tb_cap // 16) * 16))
    grid = _cdiv(B16, tb)
    # v7x megacore: keep >=2 grid steps so both TensorCores get work.
    if grid == 1 and B16 >= 64:
        grid = 2
    # Re-balance the tile so batch padding stays bounded (<~16 rows per step).
    tb = _round_up(_cdiv(B16, grid), 16)
    Bp = grid * tb

    def pad2(a, r, c, dtype):
        out = jnp.zeros((r, c), dtype)
        return out.at[: a.shape[0], : a.shape[1]].set(a.astype(dtype))

    # Skip the extra HBM pad/cast pass over x when the layout already fits:
    # pass f32 x straight into the kernel and cast to bf16 on the VPU.
    x_direct = (D_in == Dp_in) and (B == Bp)
    xp = x if x_direct else pad2(x, Bp, Dp_in, jnp.bfloat16)
    wep = pad2(we, Dp_in, Hp, jnp.bfloat16)
    bep = pad2(be.reshape(1, -1), 1, Hp, jnp.float32)
    wdxp = pad2(wdx, Dp_in, Dp_out, jnp.bfloat16)
    wdep = pad2(wde, Hp, Dp_out, jnp.bfloat16)
    bdp = pad2(bd.reshape(1, -1), 1, Dp_out, jnp.float32)

    tile = lambda r, c: pl.BlockSpec((r, c), lambda i: (i, 0))   # batch-tiled
    resident = lambda r, c: pl.BlockSpec((r, c), lambda i: (0, 0),
                                         pipeline_mode=pl.Buffered(1))

    out_itemsize = jnp.dtype(out_dtype).itemsize
    flops = 2 * Bp * (Dp_in * Hp + Dp_in * Dp_out + Hp * Dp_out)
    bytes_accessed = (xp.size * xp.dtype.itemsize
                      + (wep.size + wdxp.size + wdep.size) * 2
                      + (bep.size + bdp.size) * 4
                      + (Bp * Hp + Bp * Dp_out) * out_itemsize)

    enc_p, dec_p = pl.pallas_call(
        _enc_dec_kernel,
        out_shape=(
            jax.ShapeDtypeStruct((Bp, Hp), out_dtype),
            jax.ShapeDtypeStruct((Bp, Dp_out), out_dtype),
        ),
        grid_spec=pltpu.PrefetchScalarGridSpec(
            num_scalar_prefetch=0,
            grid=(grid,),
            in_specs=[
                tile(tb, Dp_in),          # x     (per batch tile, 2 buffers)
                resident(Dp_in, Hp),      # We    (VMEM-resident, 1 buffer)
                resident(1, Hp),          # be
                resident(Dp_in, Dp_out),  # Wd_x
                resident(Hp, Dp_out),     # Wd_e
                resident(1, Dp_out),      # bd
            ],
            out_specs=[
                tile(tb, Hp),             # encoder_output (bf16)
                tile(tb, Dp_out),         # decoder_output (bf16)
            ],
        ),
        compiler_params=pltpu.CompilerParams(
            dimension_semantics=("parallel",),       # megacore-shard batch axis
            vmem_limit_bytes=vmem_limit,
        ),
        cost_estimate=pl.CostEstimate(
            flops=int(flops), transcendentals=0,
            bytes_accessed=int(bytes_accessed)),
    )(xp, wep, bep, wdxp, wdep, bdp)

    # Slice off batch / feature padding only when padding was applied.
    enc_out = enc_p if (Bp == B and Hp == H) else enc_p[:B, :H]
    dec_out = dec_p if (Bp == B and Dp_out == D_out) else dec_p[:B, :D_out]
    return enc_out, dec_out


if __name__ == "__main__":
    # Small, deterministic shapes (correctness smoke test only; perf features
    # above target realistic B / feature dims): batch=8, D_in=32, H=32, D_out=32.
    B, D_in, H, D_out = 8, 32, 32, 32
    key = jax.random.PRNGKey(0)
    k_x, k_we, k_be, k_wd, k_bd = jax.random.split(key, 5)

    x = jax.random.normal(k_x, (B, D_in), dtype=jnp.float32)

    # Encoder params (Linear D_in -> H).
    we = jax.random.normal(k_we, (D_in, H), dtype=jnp.float32) * 0.05
    be = jax.random.normal(k_be, (H,), dtype=jnp.float32) * 0.05

    # Decoder params (Linear (D_in + H) -> D_out).
    wd = jax.random.normal(k_wd, (D_in + H, D_out), dtype=jnp.float32) * 0.05
    bd = jax.random.normal(k_bd, (D_out,), dtype=jnp.float32) * 0.05

    enc_out, dec_out = encoder_decoder_forward(x, we, be, wd, bd)
    jax.block_until_ready((enc_out, dec_out))

    enc_f = enc_out.astype(jnp.float32)
    dec_f = dec_out.astype(jnp.float32)

    # Pure-JAX reference with matching bf16 matmul-input / bf16 output precision.
    xb = x.astype(jnp.bfloat16).astype(jnp.float32)
    web = we.astype(jnp.bfloat16).astype(jnp.float32)
    wdxb = wd[:D_in].astype(jnp.bfloat16).astype(jnp.float32)
    wdeb = wd[D_in:].astype(jnp.bfloat16).astype(jnp.float32)
    enc_ref = jnp.maximum(xb @ web + be, 0.0)
    enc_ref_b = enc_ref.astype(jnp.bfloat16).astype(jnp.float32)
    dec_ref = xb @ wdxb + enc_ref_b @ wdeb + bd

    assert jnp.allclose(enc_f, enc_ref, atol=1.5e-2, rtol=1.5e-2), \
        float(jnp.max(jnp.abs(enc_f - enc_ref)))
    assert jnp.allclose(dec_f, dec_ref, atol=1.5e-2, rtol=1.5e-2), \
        float(jnp.max(jnp.abs(dec_f - dec_ref)))

    # Loose check against the full-f32 math (bf16 I/O, small magnitudes).
    enc_f32 = jnp.maximum(x @ we + be, 0.0)
    dec_f32 = jnp.concatenate([x, enc_f32], axis=-1) @ wd + bd
    assert jnp.allclose(enc_f, enc_f32, atol=7e-2, rtol=7e-2)
    assert jnp.allclose(dec_f, dec_f32, atol=7e-2, rtol=7e-2)

    print("KERNEL_OK")
</pallas_src>

<mosaic_0001>
module attributes {stable_mosaic.version = 11 : i64} {
  func.func @_enc_dec_kernel(%arg0: i32, %arg1: memref<16x128xbf16, #tpu.memory_space<vmem>>, %arg2: memref<128x128xbf16, #tpu.memory_space<vmem>>, %arg3: memref<1x128xf32, #tpu.memory_space<vmem>>, %arg4: memref<128x128xbf16, #tpu.memory_space<vmem>>, %arg5: memref<128x128xbf16, #tpu.memory_space<vmem>>, %arg6: memref<1x128xf32, #tpu.memory_space<vmem>>, %arg7: memref<16x128xbf16, #tpu.memory_space<vmem>>, %arg8: memref<16x128xbf16, #tpu.memory_space<vmem>>) attributes {dimension_semantics = [#tpu.dimension_semantics<parallel>], iteration_bounds = array<i64: 1>, scalar_prefetch = 0 : i64, scratch_operands = 0 : i64, tpu.core_type = #tpu.core_type<tc>, window_params = [{transform_indices = @transform_0, window_bounds = array<i64: 16, 128>}, {pipeline_mode = #tpu.pipeline_mode<synchronous>, transform_indices = @transform_1, window_bounds = array<i64: 128, 128>}, {pipeline_mode = #tpu.pipeline_mode<synchronous>, transform_indices = @transform_2, window_bounds = array<i64: 1, 128>}, {pipeline_mode = #tpu.pipeline_mode<synchronous>, transform_indices = @transform_3, window_bounds = array<i64: 128, 128>}, {pipeline_mode = #tpu.pipeline_mode<synchronous>, transform_indices = @transform_4, window_bounds = array<i64: 128, 128>}, {pipeline_mode = #tpu.pipeline_mode<synchronous>, transform_indices = @transform_5, window_bounds = array<i64: 1, 128>}, {transform_indices = @transform_6, window_bounds = array<i64: 16, 128>}, {transform_indices = @transform_7, window_bounds = array<i64: 16, 128>}]} {
    %c0 = arith.constant 0 : index
    %c0_0 = arith.constant 0 : index
    %0 = vector.load %arg1[%c0, %c0_0] : memref<16x128xbf16, #tpu.memory_space<vmem>>, vector<16x128xbf16>
    %c0_1 = arith.constant 0 : index
    %c0_2 = arith.constant 0 : index
    %1 = vector.load %arg2[%c0_1, %c0_2] : memref<128x128xbf16, #tpu.memory_space<vmem>>, vector<128x128xbf16>
    %cst = arith.constant dense<0.000000e+00> : vector<16x128xf32>
    %2 = tpu.matmul %0, %1, %cst {dimension_numbers = #tpu.dot_dimension_numbers<[1], [0], [0], [1], [0, 0, 1, 1], [], []>} : vector<16x128xbf16>, vector<128x128xbf16>, vector<16x128xf32> -> vector<16x128xf32>
    %c0_3 = arith.constant 0 : index
    %c0_4 = arith.constant 0 : index
    %3 = vector.load %arg3[%c0_3, %c0_4] : memref<1x128xf32, #tpu.memory_space<vmem>>, vector<1x128xf32>
    %4 = vector.broadcast %3 : vector<1x128xf32> to vector<16x128xf32>
    %5 = arith.addf %2, %4 : vector<16x128xf32>
    %cst_5 = arith.constant 0.000000e+00 : f32
    %6 = vector.broadcast %cst_5 : f32 to vector<16x128xf32>
    %7 = arith.maximumf %5, %6 : vector<16x128xf32>
    %8 = arith.truncf %7 : vector<16x128xf32> to vector<16x128xbf16>
    %c0_6 = arith.constant 0 : index
    %c0_7 = arith.constant 0 : index
    %9 = vector.load %arg7[%c0_6, %c0_7] : memref<16x128xbf16, #tpu.memory_space<vmem>>, vector<16x128xbf16>
    tpu.vector_store %arg7[%c0_6, %c0_7], %8 {strides = array<i32>} : memref<16x128xbf16, #tpu.memory_space<vmem>>, vector<16x128xbf16>,
    %c0_8 = arith.constant 0 : index
    %c0_9 = arith.constant 0 : index
    %10 = vector.load %arg4[%c0_8, %c0_9] : memref<128x128xbf16, #tpu.memory_space<vmem>>, vector<128x128xbf16>
    %cst_10 = arith.constant dense<0.000000e+00> : vector<16x128xf32>
    %11 = tpu.matmul %0, %10, %cst_10 {dimension_numbers = #tpu.dot_dimension_numbers<[1], [0], [0], [1], [0, 0, 1, 1], [], []>} : vector<16x128xbf16>, vector<128x128xbf16>, vector<16x128xf32> -> vector<16x128xf32>
    %c0_11 = arith.constant 0 : index
    %c0_12 = arith.constant 0 : index
    %12 = vector.load %arg5[%c0_11, %c0_12] : memref<128x128xbf16, #tpu.memory_space<vmem>>, vector<128x128xbf16>
    %cst_13 = arith.constant dense<0.000000e+00> : vector<16x128xf32>
    %13 = tpu.matmul %8, %12, %cst_13 {dimension_numbers = #tpu.dot_dimension_numbers<[1], [0], [0], [1], [0, 0, 1, 1], [], []>} : vector<16x128xbf16>, vector<128x128xbf16>, vector<16x128xf32> -> vector<16x128xf32>
    %14 = arith.addf %11, %13 : vector<16x128xf32>
    %c0_14 = arith.constant 0 : index
    %c0_15 = arith.constant 0 : index
    %15 = vector.load %arg6[%c0_14, %c0_15] : memref<1x128xf32, #tpu.memory_space<vmem>>, vector<1x128xf32>
    %16 = vector.broadcast %15 : vector<1x128xf32> to vector<16x128xf32>
    %17 = arith.addf %14, %16 : vector<16x128xf32>
    %18 = arith.truncf %17 : vector<16x128xf32> to vector<16x128xbf16>
    %c0_16 = arith.constant 0 : index
    %c0_17 = arith.constant 0 : index
    %19 = vector.load %arg8[%c0_16, %c0_17] : memref<16x128xbf16, #tpu.memory_space<vmem>>, vector<16x128xbf16>
    tpu.vector_store %arg8[%c0_16, %c0_17], %18 {strides = array<i32>} : memref<16x128xbf16, #tpu.memory_space<vmem>>, vector<16x128xbf16>,
    return
  }
  func.func @transform_0(%arg0: i32) -> (i32, i32) {
    %c0_i32 = arith.constant 0 : i32
    %c0_i32_0 = arith.constant 0 : i32
    return %arg0, %c0_i32 : i32, i32
  }
  func.func @transform_1(%arg0: i32) -> (i32, i32) {
    %c0_i32 = arith.constant 0 : i32
    %c0_i32_0 = arith.constant 0 : i32
    %c0_i32_1 = arith.constant 0 : i32
    return %c0_i32, %c0_i32_0 : i32, i32
  }
  func.func @transform_2(%arg0: i32) -> (i32, i32) {
    %c0_i32 = arith.constant 0 : i32
    %c0_i32_0 = arith.constant 0 : i32
    %c0_i32_1 = arith.constant 0 : i32
    return %c0_i32, %c0_i32_0 : i32, i32
  }
  func.func @transform_3(%arg0: i32) -> (i32, i32) {
    %c0_i32 = arith.constant 0 : i32
    %c0_i32_0 = arith.constant 0 : i32
    %c0_i32_1 = arith.constant 0 : i32
    return %c0_i32, %c0_i32_0 : i32, i32
  }
  func.func @transform_4(%arg0: i32) -> (i32, i32) {
    %c0_i32 = arith.constant 0 : i32
    %c0_i32_0 = arith.constant 0 : i32
    %c0_i32_1 = arith.constant 0 : i32
    return %c0_i32, %c0_i32_0 : i32, i32
  }
  func.func @transform_5(%arg0: i32) -> (i32, i32) {
    %c0_i32 = arith.constant 0 : i32
    %c0_i32_0 = arith.constant 0 : i32
    %c0_i32_1 = arith.constant 0 : i32
    return %c0_i32, %c0_i32_0 : i32, i32
  }
  func.func @transform_6(%arg0: i32) -> (i32, i32) {
    %c0_i32 = arith.constant 0 : i32
    %c0_i32_0 = arith.constant 0 : i32
    return %arg0, %c0_i32 : i32, i32
  }
  func.func @transform_7(%arg0: i32) -> (i32, i32) {
    %c0_i32 = arith.constant 0 : i32
    %c0_i32_0 = arith.constant 0 : i32
    return %arg0, %c0_i32 : i32, i32
  }
}

</mosaic_0001>

<bundles_post_ra>
// kernel: tpu_custom_call.1
= control target key start
LH: loop header
LB: loop body
LE: loop exit
PB: predicated region body
PF: predicated region fallthrough
CT: control target
= control target key end

     0   :  { %13 = vsyncpa [#allocation3], 0  ;;  %s978_s0 = inlined_call_operand.hbm [shape: bf16[16,128], index: 0, kind: input, shape index: {}]   ;;  %s979_s1 = inlined_call_operand.hbm [shape: bf16[128,128], index: 1, kind: input, shape index: {}]   ;;  %s980_s2 = inlined_call_operand.vmem [shape: f32[1,128], index: 2, kind: input, shape index: {}]   ;;  %s981_s3 = inlined_call_operand.hbm [shape: bf16[128,128], index: 3, kind: input, shape index: {}]   ;;  %s982_s4 = inlined_call_operand.hbm [shape: bf16[128,128], index: 4, kind: input, shape index: {}]   ;;  %s983_s5 = inlined_call_operand.vmem [shape: f32[1,128], index: 5, kind: input, shape index: {}]   ;;  %s984_s6 = inlined_call_operand.hbm [shape: bf16[16,128], index: 6, kind: output, shape index: {0}]   ;;  %s985_s7 = inlined_call_operand.hbm [shape: bf16[16,128], index: 7, kind: output, shape index: {1}]  }
   0x1   :  { %14 = vsyncpa [#allocation6], 0 }
   0x2   :  { %15 = vsyncpa [#allocation9], 0 }
   0x3   :  { %16 = vsyncpa [#allocation4], 0 }
   0x4   :  { %17 = vsyncpa [#allocation12], 0  ;;  %s788_s24 = smov [#allocation5]   ;;  %s789_s26 = smov [#allocation2]  }
   0x5   :  { %s35_s25 = sshll.u32 %s788_s24, 4  ;;  %s23_s27 = sshll.u32 %s789_s26, 4  ;;  %s36_s25 = int_to_ptr.vmem [resolvable:$true] %s35_s25  ;;  %s838_s27 = int_to_ptr.vmem [resolvable:$true] %s23_s27 }
   0x6   :  { %s646_s30 = scalar_lea.hbm %s979_s1, 1024 }
   0x7   :  { %p647_p0 = scmp.ne.s32.totalorder %s979_s1, %s646_s30  ;;  %p650_p1 = scmp.lt.u32.totalorder %s646_s30, %s979_s1 }
   0x9   :  { %p652_p2 = pnand %p650_p1, %p647_p0 }
   0xb   :  { %655 = shalt.err (!%p652_p2)
}
   0xc   :  { %s656_s12 = scalar_lea.vmem %s36_s25, 1024  ;;  %p661_p4 = scmp.lt.s32.totalorder %s36_s25, %s36_s25 }
   0xd   :  { %p657_p3 = scmp.ne.s32.totalorder %s36_s25, %s656_s12  ;;  %p662_p5 = scmp.lt.s32.totalorder %s656_s12, %s656_s12 }
   0xf   :  { %p663_p6 = por %p662_p5, %p661_p4 }
  0x11   :  { %p664_p7 = pnand %p663_p6, %p657_p3 }
  0x13   :  { %667 = shalt.err (!%p664_p7)
}
  0x14   :  { %s790_s13 = smov 64   ;;  %s791_s14 = smov 4  }
  0x15   :  { %41 = dma.hbm_to_vmem [thread:$0]  %s979_s1, 1024, %s36_s25, [#allocation6], %s790_s13, %s790_s13, %s791_s14  }
  0x16   :  { %s668_s19 = scalar_lea.hbm %s978_s0, 128 }
  0x17   :  { %p669_p8 = scmp.ne.s32.totalorder %s978_s0, %s668_s19  ;;  %p672_p9 = scmp.lt.u32.totalorder %s668_s19, %s978_s0 }
  0x19   :  { %p674_p10 = pnand %p672_p9, %p669_p8 }
  0x1b   :  { %677 = shalt.err (!%p674_p10)
}
  0x1c   :  { %s678_s24 = scalar_lea.vmem %s838_s27, 128  ;;  %p683_p12 = scmp.lt.s32.totalorder %s838_s27, %s838_s27 }
  0x1d   :  { %p679_p11 = scmp.ne.s32.totalorder %s838_s27, %s678_s24  ;;  %p684_p13 = scmp.lt.s32.totalorder %s678_s24, %s678_s24 }
  0x1f   :  { %p685_p0 = por %p684_p13, %p683_p12 }
  0x21   :  { %p686_p1 = pnand %p685_p0, %p679_p11 }
  0x23   :  { %689 = shalt.err (!%p686_p1)
}
  0x24   :  { %29 = dma.hbm_to_vmem [thread:$0]  %s978_s0, 128, %s838_s27, [#allocation3], %s790_s13, %s790_s13, %s791_s14  }
  0x25   :  { %s792_s26 = smov [#allocation7]   ;;  %s793_s29 = smov [#allocation8]  }
  0x26   :  { %s49_s28 = sshll.u32 %s792_s26, 4  ;;  %s61_s30 = sshll.u32 %s793_s29, 4  ;;  %s50_s28 = int_to_ptr.vmem [resolvable:$true] %s49_s28  ;;  %s875_s30 = int_to_ptr.vmem [resolvable:$true] %s61_s30 }
  0x27   :  { %s690_s10 = scalar_lea.hbm %s981_s3, 1024 }
  0x28   :  { %p691_p2 = scmp.ne.s32.totalorder %s981_s3, %s690_s10  ;;  %p694_p3 = scmp.lt.u32.totalorder %s690_s10, %s981_s3 }
  0x2a   :  { %p696_p4 = pnand %p694_p3, %p691_p2 }
  0x2c   :  { %699 = shalt.err (!%p696_p4)
}
  0x2d   :  { %s700_s0 = scalar_lea.vmem %s50_s28, 1024  ;;  %p705_p6 = scmp.lt.s32.totalorder %s50_s28, %s50_s28 }
  0x2e   :  { %p701_p5 = scmp.ne.s32.totalorder %s50_s28, %s700_s0  ;;  %p706_p7 = scmp.lt.s32.totalorder %s700_s0, %s700_s0 }
  0x30   :  { %p707_p8 = por %p706_p7, %p705_p6 }
  0x32   :  { %p708_p9 = pnand %p707_p8, %p701_p5 }
  0x34   :  { %711 = shalt.err (!%p708_p9)
}
  0x35   :  { %55 = dma.hbm_to_vmem [thread:$0]  %s981_s3, 1024, %s50_s28, [#allocation6], %s790_s13, %s790_s13, %s791_s14  }
  0x36   :  { %s712_s20 = scalar_lea.hbm %s982_s4, 1024 }
  0x37   :  { %p713_p10 = scmp.ne.s32.totalorder %s982_s4, %s712_s20  ;;  %p716_p11 = scmp.lt.u32.totalorder %s712_s20, %s982_s4 }
  0x39   :  { %p718_p12 = pnand %p716_p11, %p713_p10 }
  0x3b   :  { %721 = shalt.err (!%p718_p12)
}
  0x3c   :  { %s722_s1 = scalar_lea.vmem %s875_s30, 1024  ;;  %p727_p0 = scmp.lt.s32.totalorder %s875_s30, %s875_s30 }
  0x3d   :  { %p723_p13 = scmp.ne.s32.totalorder %s875_s30, %s722_s1  ;;  %p728_p1 = scmp.lt.s32.totalorder %s722_s1, %s722_s1 }
  0x3f   :  { %p729_p2 = por %p728_p1, %p727_p0 }
  0x41   :  { %p730_p3 = pnand %p729_p2, %p723_p13 }
  0x43   :  { %733 = shalt.err (!%p730_p3)
}
  0x44   :  { %67 = dma.hbm_to_vmem [thread:$0]  %s982_s4, 1024, %s875_s30, [#allocation9], %s790_s13, %s790_s13, %s791_s14  }
  0x45   :  { %778 = dma.done.wait [#allocation3], 128  }
  0x46   :  { %779 = vsyncadd [#allocation3], 4294967168 }
  0x47   :  { %780 = dma.done.wait [#allocation6], 2048  }
  0x48   :  { %781 = vsyncadd [#allocation6], 4294965248 }
  0x49   :  { %782 = dma.done.wait [#allocation9], 1024  }
  0x4a   :  { %783 = vsyncadd [#allocation9], 4294966272  ;;  %v794_v0 = vmov 0.0   ;;  %vm795_vm0 = vmmov 0   ;;  %v621_v1 = vld [vmem:[#allocation5] sm:$0xff]   ;;  %v622_v2 = vld [vmem:[#allocation5 + $0x8] sm:$0xff]  }
  0x4b   :  { %551 = vmatprep.subr.bf16.mxu0 %v794_v0  ;;  %567 = vmatprep.mubr.msk.bf16.mxu0 %vm795_vm0, %v794_v0  ;;  %v623_v3 = vld [vmem:[#allocation5 + $0x10] sm:$0xff]   ;;  %v624_v4 = vld [vmem:[#allocation5 + $0x18] sm:$0xff]   ;;  %v631_v5 = vld [vmem:[#allocation8] sm:$0xff]   ;;  %s796_s28 = smov [#allocation10]  }
  0x4c   :  { %571 = vmatprep.subr.bf16.mxu1 %v794_v0  ;;  %587 = vmatprep.mubr.msk.bf16.mxu1 %vm795_vm0, %v794_v0  ;;  %v633_v6 = vld [vmem:[#allocation8 + $0x8] sm:$0xff]   ;;  %v625_v7 = vld [vmem:[#allocation5 + $0x20] sm:$0xff]   ;;  %v635_v8 = vld [vmem:[#allocation8 + $0x10] sm:$0xff]   ;;  %s449_s29 = sshll.u32 %s796_s28, 4  ;;  %s450_s29 = int_to_ptr.vmem [resolvable:$true] %s449_s29 }
  0x4d   :  { %552 = vmatpush3.bf16.msra.mxu0 %v621_v1  ;;  %572 = vmatpush3.bf16.msra.mxu1 %v631_v5  ;;  %v626_v9 = vld [vmem:[#allocation5 + $0x28] sm:$0xff]   ;;  %v637_v10 = vld [vmem:[#allocation8 + $0x18] sm:$0xff]   ;;  %v627_v11 = vld [vmem:[#allocation5 + $0x30] sm:$0xff]   ;;  %s734_s30 = scalar_lea.vmem %s450_s29, 128  ;;  %p739_p5 = scmp.lt.s32.totalorder %s450_s29, %s450_s29 }
  0x4e   :  { %553 = vmatprep.subr.bf16.mxu0 %v794_v0  ;;  %573 = vmatprep.subr.bf16.mxu1 %v794_v0  ;;  %v639_v12 = vld [vmem:[#allocation8 + $0x20] sm:$0xff]   ;;  %v628_v13 = vld [vmem:[#allocation5 + $0x38] sm:$0xff]   ;;  %v641_v14 = vld [vmem:[#allocation8 + $0x28] sm:$0xff]   ;;  %p735_p4 = scmp.ne.s32.totalorder %s450_s29, %s734_s30  ;;  %p740_p6 = scmp.lt.s32.totalorder %s734_s30, %s734_s30 }
  0x4f   :  { %v629_v15 = vld [vmem:[#allocation2] sm:$0xff]   ;;  %v630_v16 = vld [vmem:[#allocation7] sm:$0xff]   ;;  %v632_v17 = vld [vmem:[#allocation7 + $0x8] sm:$0xff]  }
  0x50   :  { %v634_v18 = vld [vmem:[#allocation7 + $0x10] sm:$0xff]   ;;  %v636_v19 = vld [vmem:[#allocation7 + $0x18] sm:$0xff]   ;;  %v638_v20 = vld [vmem:[#allocation7 + $0x20] sm:$0xff]   ;;  %p741_p7 = por %p740_p6, %p739_p5 }
  0x51   :  { %554 = vmatpush3.bf16.msra.mxu0 %v622_v2  ;;  %574 = vmatpush3.bf16.msra.mxu1 %v633_v6  ;;  %v640_v21 = vld [vmem:[#allocation7 + $0x28] sm:$0xff]   ;;  %v642_v22 = vld [vmem:[#allocation7 + $0x30] sm:$0xff]   ;;  %v644_v24 = vld [vmem:[#allocation7 + $0x38] sm:$0xff]  }
  0x52   :  { %555 = vmatprep.subr.bf16.mxu0 %v794_v0  ;;  %575 = vmatprep.subr.bf16.mxu1 %v794_v0  ;;  %v643_v23 = vld [vmem:[#allocation8 + $0x30] sm:$0xff]   ;;  %v645_v25 = vld [vmem:[#allocation8 + $0x38] sm:$0xff]   ;;  %p742_p8 = pnand %p741_p7, %p735_p4 }
  0x53   :  { %v479_v26 = vld [vmem:[%s980_s2] ss:$0 sm:$0xff] }
  0x55   :  { %556 = vmatpush3.bf16.msra.mxu0 %v623_v3  ;;  %576 = vmatpush3.bf16.msra.mxu1 %v635_v8 }
  0x56   :  { %557 = vmatprep.subr.bf16.mxu0 %v794_v0  ;;  %577 = vmatprep.subr.bf16.mxu1 %v794_v0 }
  0x59   :  { %558 = vmatpush3.bf16.msra.mxu0 %v624_v4  ;;  %578 = vmatpush3.bf16.msra.mxu1 %v637_v10 }
  0x5a   :  { %559 = vmatprep.subr.bf16.mxu0 %v794_v0  ;;  %579 = vmatprep.subr.bf16.mxu1 %v794_v0 }
  0x5d   :  { %560 = vmatpush3.bf16.msra.mxu0 %v625_v7  ;;  %580 = vmatpush3.bf16.msra.mxu1 %v639_v12 }
  0x5e   :  { %561 = vmatprep.subr.bf16.mxu0 %v794_v0  ;;  %581 = vmatprep.subr.bf16.mxu1 %v794_v0 }
  0x61   :  { %562 = vmatpush3.bf16.msra.mxu0 %v626_v9  ;;  %582 = vmatpush3.bf16.msra.mxu1 %v641_v14 }
  0x62   :  { %563 = vmatprep.subr.bf16.mxu0 %v794_v0  ;;  %583 = vmatprep.subr.bf16.mxu1 %v794_v0 }
  0x65   :  { %564 = vmatpush3.bf16.msra.mxu0 %v627_v11  ;;  %584 = vmatpush3.bf16.msra.mxu1 %v643_v23 }
  0x66   :  { %565 = vmatprep.subr.bf16.mxu0 %v794_v0  ;;  %585 = vmatprep.subr.bf16.mxu1 %v794_v0 }
  0x69   :  { %566 = vmatpush3.bf16.msra.mxu0 %v628_v13  ;;  %586 = vmatpush3.bf16.msra.mxu1 %v645_v25 }
  0x6a   :  { %591 = vmatprep.subr.bf16.mxu0 %v794_v0 }
  0x6c   :  { %568 = vmatmul.mubr.bf16.vlgmr.msra.gmra.mrb[0].mxu0 %v629_v15 }
  0x6d   :  { %592 = vmatpush3.bf16.msra.mxu0 %v630_v16  ;;  %607 = vmatprep.mubr.msk.bf16.mxu0 %vm795_vm0, %v794_v0 }
  0x6e   :  { %593 = vmatprep.subr.bf16.mxu0 %v794_v0 }
  0x71   :  { %594 = vmatpush3.bf16.msra.mxu0 %v632_v17 }
  0x72   :  { %595 = vmatprep.subr.bf16.mxu0 %v794_v0 }
  0x75   :  { %596 = vmatpush3.bf16.msra.mxu0 %v634_v18 }
  0x76   :  { %597 = vmatprep.subr.bf16.mxu0 %v794_v0 }
  0x79   :  { %598 = vmatpush3.bf16.msra.mxu0 %v636_v19 }
  0x7a   :  { %599 = vmatprep.subr.bf16.mxu0 %v794_v0 }
  0x7d   :  { %600 = vmatpush3.bf16.msra.mxu0 %v638_v20 }
  0x7e   :  { %601 = vmatprep.subr.bf16.mxu0 %v794_v0 }
  0x81   :  { %602 = vmatpush3.bf16.msra.mxu0 %v640_v21 }
  0x82   :  { %603 = vmatprep.subr.bf16.mxu0 %v794_v0 }
  0x85   :  { %604 = vmatpush3.bf16.msra.mxu0 %v642_v22 }
  0x86   :  { %605 = vmatprep.subr.bf16.mxu0 %v794_v0 }
  0x89   :  { %606 = vmatpush3.bf16.msra.mxu0 %v644_v24 }
  0x8c   :  { %608 = vmatmul.mubr.bf16.vlgmr.msra.gmra.mrb[4].mxu0 %v629_v15 }
 0x13f   :  { %v196_v27 = vpop.f32.mrb[0].mxu0 }
 0x140   :  { %v197_v28 = vadd.f32 %v479_v26, %v196_v27  ;;  %v569_v29 = vpop.f32.mrb[1].mxu0 }
 0x141   :  { %v199_v30 = vpop.f32.mrb[2].mxu0 }
 0x142   :  { %v200_v31 = vadd.f32 %v479_v26, %v199_v30  ;;  %v570_v32 = vpop.f32.mrb[3].mxu0  ;;  %v203_v33 = vmax.f32 %v197_v28, 0.0 }
 0x144   :  { %v204_v34 = vmax.f32 %v200_v31, 0.0 }
 0x146   :  { %v205_v35 = vpack.c.bf16 %v204_v34, %v203_v33 }
 0x148   :  { %518 = vst [vmem:[#allocation10] sm:$0xff] %v205_v35   ;;  %588 = vmatmul.mubr.bf16.vlgmr.msra.gmra.mrb[0].mxu1 %v205_v35 }
 0x15f   :  { %v418_v36 = vpop.f32.mrb[4].mxu0 }
 0x160   :  { %v609_v37 = vpop.f32.mrb[5].mxu0 }
 0x161   :  { %v421_v38 = vpop.f32.mrb[6].mxu0 }
 0x162   :  { %v610_v39 = vpop.f32.mrb[7].mxu0 }
 0x163   :  { %745 = shalt.err (!%p742_p8)
}
 0x164   :  { %s746_s9 = scalar_lea.hbm %s984_s6, 128 }
 0x165   :  { %p747_p9 = scmp.ne.s32.totalorder %s984_s6, %s746_s9  ;;  %p750_p10 = scmp.lt.u32.totalorder %s746_s9, %s984_s6 }
 0x167   :  { %p752_p11 = pnand %p750_p10, %p747_p9 }
 0x169   :  { %755 = shalt.err (!%p752_p11)
}
 0x16a   :  { %455 = dma.vmem_to_hbm [thread:$0]  %s450_s29, 128, %s984_s6, [#allocation4], %s790_s13, %s790_s13, %s791_s14  }
 0x16b   :  { %v507_v43 = vld [vmem:[%s983_s5] ss:$0 sm:$0xff]  ;;  %s797_s18 = smov [#allocation11]  }
 0x16c   :  { %s461_s19 = sshll.u32 %s797_s18, 4  ;;  %s462_s19 = int_to_ptr.vmem [resolvable:$true] %s461_s19 }
 0x16d   :  { %s756_s20 = scalar_lea.vmem %s462_s19, 128  ;;  %p761_p13 = scmp.lt.s32.totalorder %s462_s19, %s462_s19 }
 0x16e   :  { %p757_p12 = scmp.ne.s32.totalorder %s462_s19, %s756_s20  ;;  %p762_p0 = scmp.lt.s32.totalorder %s756_s20, %s756_s20 }
 0x170   :  { %p763_p1 = por %p762_p0, %p761_p13 }
 0x172   :  { %p764_p2 = pnand %p763_p1, %p757_p12 }
 0x21b   :  { %v329_v40 = vpop.f32.mrb[0].mxu1 }
 0x21c   :  { %v419_v41 = vadd.f32 %v418_v36, %v329_v40  ;;  %v589_v42 = vpop.f32.mrb[1].mxu1 }
 0x21d   :  { %v332_v44 = vpop.f32.mrb[2].mxu1 }
 0x21e   :  { %v422_v45 = vadd.f32 %v421_v38, %v332_v44  ;;  %v590_v46 = vpop.f32.mrb[3].mxu1  ;;  %v432_v47 = vadd.f32 %v507_v43, %v419_v41 }
 0x220   :  { %v433_v48 = vadd.f32 %v507_v43, %v422_v45 }
 0x222   :  { %v522_v49 = vpack.c.bf16 %v433_v48, %v432_v47 }
 0x224   :  { %523 = vst [vmem:[#allocation11] sm:$0xff] %v522_v49  }
 0x225   :  { %767 = shalt.err (!%p764_p2)
}
 0x226   :  { %s768_s5 = scalar_lea.hbm %s985_s7, 128 }
 0x227   :  { %p769_p3 = scmp.ne.s32.totalorder %s985_s7, %s768_s5  ;;  %p772_p4 = scmp.lt.u32.totalorder %s768_s5, %s985_s7 }
 0x229   :  { %p774_p5 = pnand %p772_p4, %p769_p3 }
 0x22b   :  { %777 = shalt.err (!%p774_p5)
}
 0x22c   :  { %467 = dma.vmem_to_hbm [thread:$0]  %s462_s19, 128, %s985_s7, [#allocation12], %s790_s13, %s790_s13, %s791_s14  }
 0x22d   :  { %784 = dma.done.wait [#allocation4], 128  }
 0x22e   :  { %785 = vsyncadd [#allocation4], 4294967168 }
 0x22f   :  { %786 = dma.done.wait [#allocation12], 128  }
 0x230   :  { %787 = vsyncadd [#allocation12], 4294967168 }
 0x231   :  { %474 = vsyncpa [#allocation3], 1 }
 0x232   :  { %475 = vsyncpa [#allocation6], 1 }
 0x233   :  { %476 = vsyncpa [#allocation9], 1 }
 0x234   :  { %477 = vsyncpa [#allocation4], 1 }
 0x235   :  { %478 = vsyncpa [#allocation12], 1 }

</bundles_post_ra>
